<compile_context>
chip_gen: v7x
topology: tpu7x:2x2x1
jax: 0.10.0
libtpu: 0.0.40
codegen_flags: <defaults>
</compile_context>

<pallas_src>
import jax
import jax.numpy as jnp
import numpy as np
from jax import lax
from jax.experimental import pallas as pl
from jax.experimental.pallas import tpu as pltpu

IN_CH = 16
OUT_CH = 120
KH = KW = 5
K_RAW = IN_CH * KH * KW          # 400 -- contracted directly (no HBM pad pass)
OC_PAD = 128                     # 120 -> 128 (lane-dense output stores, no vst.msk)


def _round_up(a, b):
    return (a + b - 1) // b * b


def _conv_tanh_kernel(p_ref, w_ref, b_ref, o_ref):
    # p_ref: (TM, K_RAW)      bf16 im2col patch tile
    # w_ref: (K_RAW, OC_PAD)  bf16 flattened conv weights (OC zero padded)
    # b_ref: (1, OC_PAD)      f32 bias (zero padded)
    # o_ref: (TM, OC_PAD)     f32 tanh(conv) output tile
    acc = jnp.dot(p_ref[...], w_ref[...], preferred_element_type=jnp.float32)
    o_ref[...] = jnp.tanh(acc + b_ref[...]).astype(o_ref.dtype)


def c3_forward(x_nchw, weight, bias, *, compute_dtype=jnp.bfloat16, tm_max=1024):
    """LeNet C3: Conv2d(16 -> 120, 5x5, VALID) + Tanh.  NCHW in, NCHW out."""
    N, C, H, W = x_nchw.shape
    assert C == IN_CH
    OH, OW = H - KH + 1, W - KW + 1
    M = N * OH * OW

    # Patch extraction fused by XLA; output feature order is (c, kh, kw), which
    # matches weight.reshape(OUT_CH, C*KH*KW).
    patches = lax.conv_general_dilated_patches(
        x_nchw.astype(compute_dtype), (KH, KW), (1, 1), "VALID",
        dimension_numbers=("NCHW", "OIHW", "NHWC"))          # (N, OH, OW, K_RAW)
    patches = patches.reshape(M, K_RAW)

    # Row tile: multiple of 8, <= tm_max, and aim for >= 2 grid steps so the
    # "parallel" axis splits across both v7x TensorCores and the auto-pipeline
    # overlaps patch DMA with MXU work.  Zero-padded rows are inert and sliced
    # off after the kernel.
    tm = max(8, min(tm_max, _round_up(pl.cdiv(M, 2), 8)))
    Mp = _round_up(M, tm)
    if Mp > M:
        patches = jnp.pad(patches, ((0, Mp - M), (0, 0)))

    w_mat = weight.reshape(OUT_CH, K_RAW).T.astype(compute_dtype)    # (K_RAW, OC)
    w_mat = jnp.pad(w_mat, ((0, 0), (0, OC_PAD - OUT_CH)))
    b_mat = jnp.pad(bias.astype(jnp.float32).reshape(1, OUT_CH),
                    ((0, 0), (0, OC_PAD - OUT_CH)))

    grid = (Mp // tm,)
    bytes_accessed = (patches.size * patches.dtype.itemsize
                      + w_mat.size * w_mat.dtype.itemsize
                      + b_mat.size * 4
                      + Mp * OC_PAD * 4)
    cost = pl.CostEstimate(flops=2 * Mp * K_RAW * OC_PAD,
                           transcendentals=Mp * OC_PAD,
                           bytes_accessed=bytes_accessed)

    out_flat = pl.pallas_call(
        _conv_tanh_kernel,
        out_shape=jax.ShapeDtypeStruct((Mp, OC_PAD), jnp.float32),
        grid_spec=pltpu.PrefetchScalarGridSpec(
            num_scalar_prefetch=0,
            grid=grid,
            in_specs=[
                pl.BlockSpec((tm, K_RAW), lambda i: (i, 0)),       # patch tiles
                pl.BlockSpec((K_RAW, OC_PAD), lambda i: (0, 0)),   # weights (resident)
                pl.BlockSpec((1, OC_PAD), lambda i: (0, 0)),       # bias (resident)
            ],
            out_specs=pl.BlockSpec((tm, OC_PAD), lambda i: (i, 0)),
        ),
        compiler_params=pltpu.CompilerParams(
            dimension_semantics=("parallel",),       # row tiles independent -> both v7x TCs
            vmem_limit_bytes=32 * 1024 * 1024),      # fits v7x 64 MiB budget w/ headroom
        cost_estimate=cost,
    )(patches, w_mat, b_mat)

    out = out_flat[:M, :OUT_CH].reshape(N, OH, OW, OUT_CH)           # NHWC
    # NCHW to match the PyTorch module's output layout.
    # TODO(synk): drop this transpose if the downstream consumer accepts NHWC.
    return jnp.transpose(out, (0, 3, 1, 2))


if __name__ == "__main__":
    key = jax.random.PRNGKey(0)
    kx, kw, kb = jax.random.split(key, 3)

    # Small input consistent with Conv2d(in_channels=16): N=2, C=16, H=W=16 -> OH=OW=12.
    x = jax.random.normal(kx, (2, IN_CH, 16, 16), dtype=jnp.float32)

    # Deterministic synthetic parameters (PyTorch-like uniform init scale).
    fan_in = IN_CH * KH * KW
    bound = 1.0 / np.sqrt(fan_in)
    weight = jax.random.uniform(kw, (OUT_CH, IN_CH, KH, KW),
                                minval=-bound, maxval=bound, dtype=jnp.float32)
    bias = jax.random.uniform(kb, (OUT_CH,),
                              minval=-bound, maxval=bound, dtype=jnp.float32)

    fwd = jax.jit(c3_forward)
    out = jax.block_until_ready(fwd(x, weight, bias))

    # Reference check against XLA conv (same semantics as PyTorch Conv2d, NCHW).
    ref = lax.conv_general_dilated(
        x, weight, window_strides=(1, 1), padding="VALID",
        dimension_numbers=("NCHW", "OIHW", "NCHW"))
    ref = jnp.tanh(ref + bias.reshape(1, OUT_CH, 1, 1))
    # bf16 inputs with f32 accumulation: loosened tolerance vs the f32 reference.
    np.testing.assert_allclose(np.asarray(out), np.asarray(ref), atol=3e-2, rtol=3e-2)

    print("KERNEL_OK")
</pallas_src>

<mosaic_0001>
module attributes {stable_mosaic.version = 11 : i64} {
  func.func @_conv_tanh_kernel(%arg0: i32, %arg1: memref<144x400xbf16, #tpu.memory_space<vmem>>, %arg2: memref<400x128xbf16, #tpu.memory_space<vmem>>, %arg3: memref<1x128xf32, #tpu.memory_space<vmem>>, %arg4: memref<144x128xf32, #tpu.memory_space<vmem>>) attributes {dimension_semantics = [#tpu.dimension_semantics<parallel>], iteration_bounds = array<i64: 2>, scalar_prefetch = 0 : i64, scratch_operands = 0 : i64, tpu.core_type = #tpu.core_type<tc>, window_params = [{transform_indices = @transform_0, window_bounds = array<i64: 144, 400>}, {pipeline_mode = #tpu.pipeline_mode<synchronous>, transform_indices = @transform_1, window_bounds = array<i64: 400, 128>}, {pipeline_mode = #tpu.pipeline_mode<synchronous>, transform_indices = @transform_2, window_bounds = array<i64: 1, 128>}, {transform_indices = @transform_3, window_bounds = array<i64: 144, 128>}]} {
    %c0 = arith.constant 0 : index
    %c0_0 = arith.constant 0 : index
    %0 = vector.load %arg1[%c0, %c0_0] : memref<144x400xbf16, #tpu.memory_space<vmem>>, vector<144x400xbf16>
    %c0_1 = arith.constant 0 : index
    %c0_2 = arith.constant 0 : index
    %1 = vector.load %arg2[%c0_1, %c0_2] : memref<400x128xbf16, #tpu.memory_space<vmem>>, vector<400x128xbf16>
    %cst = arith.constant dense<0.000000e+00> : vector<144x128xf32>
    %2 = tpu.matmul %0, %1, %cst {dimension_numbers = #tpu.dot_dimension_numbers<[1], [0], [0], [1], [0, 0, 1, 1], [], []>} : vector<144x400xbf16>, vector<400x128xbf16>, vector<144x128xf32> -> vector<144x128xf32>
    %c0_3 = arith.constant 0 : index
    %c0_4 = arith.constant 0 : index
    %3 = vector.load %arg3[%c0_3, %c0_4] : memref<1x128xf32, #tpu.memory_space<vmem>>, vector<1x128xf32>
    %4 = vector.broadcast %3 : vector<1x128xf32> to vector<144x128xf32>
    %5 = arith.addf %2, %4 : vector<144x128xf32>
    %6 = math.tanh %5 : vector<144x128xf32>
    %c0_5 = arith.constant 0 : index
    %c0_6 = arith.constant 0 : index
    %7 = vector.load %arg4[%c0_5, %c0_6] : memref<144x128xf32, #tpu.memory_space<vmem>>, vector<144x128xf32>
    tpu.vector_store %arg4[%c0_5, %c0_6], %6 {strides = array<i32>} : memref<144x128xf32, #tpu.memory_space<vmem>>, vector<144x128xf32>,
    return
  }
  func.func @transform_0(%arg0: i32) -> (i32, i32) {
    %c0_i32 = arith.constant 0 : i32
    %c0_i32_0 = arith.constant 0 : i32
    return %arg0, %c0_i32 : i32, i32
  }
  func.func @transform_1(%arg0: i32) -> (i32, i32) {
    %c0_i32 = arith.constant 0 : i32
    %c0_i32_0 = arith.constant 0 : i32
    %c0_i32_1 = arith.constant 0 : i32
    return %c0_i32, %c0_i32_0 : i32, i32
  }
  func.func @transform_2(%arg0: i32) -> (i32, i32) {
    %c0_i32 = arith.constant 0 : i32
    %c0_i32_0 = arith.constant 0 : i32
    %c0_i32_1 = arith.constant 0 : i32
    return %c0_i32, %c0_i32_0 : i32, i32
  }
  func.func @transform_3(%arg0: i32) -> (i32, i32) {
    %c0_i32 = arith.constant 0 : i32
    %c0_i32_0 = arith.constant 0 : i32
    return %arg0, %c0_i32 : i32, i32
  }
}

</mosaic_0001>

<bundles_post_ra>
// kernel: c3_forward.1
= control target key start
LH: loop header
LB: loop body
LE: loop exit
PB: predicated region body
PF: predicated region fallthrough
CT: control target
= control target key end

     0   :  { %s1227_s12 = smov 0   ;;  %s1422_s0 = inlined_call_operand.vmem [shape: bf16[288,400], index: 0, kind: input, shape index: {}]   ;;  %s1423_s1 = inlined_call_operand.vmem [shape: bf16[400,128], index: 1, kind: input, shape index: {}]   ;;  %s1424_s2 = inlined_call_operand.vmem [shape: f32[1,128], index: 2, kind: input, shape index: {}]   ;;  %s1425_s3 = inlined_call_operand.vmem [shape: f32[288,128], index: 3, kind: output, shape index: {}]  }
   0x1 LB: > { %s922_s13 = sadd.s32 4294967295, %s1204_s12   ;;  %p926_p0 = scmp.ge.s32.totalorder %s1204_s12, 1  ;;  %s1204_s12 = sphi %s1227_s12, %s13_s12  }
   0x2   : > { %p139_p1 = scmp.lt.s32.totalorder %s1204_s12, 3 }
   0x4   : > { %p140_p2 = pnand %p926_p0, %p139_p1 }
   0x5   : > { %v1083_v0 = vld [vmem:[%s1423_s1 + $0x40] sm:$0xff] (!%p140_p2)   ;;  %v1206_v1 = vmov (!%p140_p2), 0   ;;  %v1086_v4 = vld [vmem:[%s1423_s1 + $0x48] sm:$0xff] (!%p140_p2)   ;;  %v1089_v7 = vld [vmem:[%s1423_s1 + $0x50] sm:$0xff] (!%p140_p2)   ;;  %s164_s30 = smul.u32 (!%p140_p2), 18, %s922_s13  ;;  %vm592_vm0 = vcmask (!%p140_p2), 130048  }
   0x6   : > { %143 = sbr.rel (%p140_p2) target bundleno = 336 (0x150), region = 32  ;;  %725 = vmatprep.subr.bf16.mxu1 (!%p140_p2), %v1206_v1  ;;  %v1084_v2 = vld [vmem:[%s1423_s1 + $0x80] sm:$0xff] (!%p140_p2)   ;;  %1004 = vmatprep.subr.bf16.mxu0 (!%p140_p2), %v1083_v0  ;;  %v1087_v5 = vld [vmem:[%s1423_s1 + $0x88] sm:$0xff] (!%p140_p2)   ;;  %v1090_v8 = vld [vmem:[%s1423_s1 + $0x90] sm:$0xff] (!%p140_p2)  }
   0x7   : > { %v1085_v3 = vld [vmem:[%s1423_s1] sm:$0xff] (!%p140_p2)   ;;  %726 = vmatpush1.bf16.msra.mxu1 (!%p140_p2), %v1084_v2  ;;  %v1088_v6 = vld [vmem:[%s1423_s1 + $0x8] sm:$0xff] (!%p140_p2)   ;;  %v1091_v9 = vld [vmem:[%s1423_s1 + $0x10] sm:$0xff] (!%p140_p2)   ;;  %p165_p3 = scmp.lt.s32.totalorder (!%p140_p2), %s164_s30, 35 }
   0x8   : > { %1005 = vmatpush3.bf16.msra.mxu0 (!%p140_p2), %v1085_v3  ;;  %727 = vmatprep.subr.bf16.mxu1 (!%p140_p2), %v1206_v1  ;;  %v1092_v10 = vld [vmem:[%s1423_s1 + $0x58] sm:$0xff] (!%p140_p2)   ;;  %v1095_v13 = vld [vmem:[%s1423_s1 + $0x60] sm:$0xff] (!%p140_p2)   ;;  %v1098_v16 = vld [vmem:[%s1423_s1 + $0x68] sm:$0xff] (!%p140_p2)  }
   0x9   : > { %1006 = vmatprep.subr.bf16.mxu0 (!%p140_p2), %v1086_v4  ;;  %v1093_v11 = vld [vmem:[%s1423_s1 + $0x98] sm:$0xff] (!%p140_p2)   ;;  %v1096_v14 = vld [vmem:[%s1423_s1 + $0xa0] sm:$0xff] (!%p140_p2)   ;;  %v1099_v17 = vld [vmem:[%s1423_s1 + $0xa8] sm:$0xff] (!%p140_p2)  }
   0xa   : > { %v1094_v12 = vld [vmem:[%s1423_s1 + $0x18] sm:$0xff] (!%p140_p2)   ;;  %v1097_v15 = vld [vmem:[%s1423_s1 + $0x20] sm:$0xff] (!%p140_p2)   ;;  %v1100_v18 = vld [vmem:[%s1423_s1 + $0x28] sm:$0xff] (!%p140_p2)  }
   0xb   : > { %728 = vmatpush1.bf16.msra.mxu1 (!%p140_p2), %v1087_v5  ;;  %v1101_v19 = vld [vmem:[%s1423_s1 + $0x70] sm:$0xff] (!%p140_p2)   ;;  %v1104_v22 = vld [vmem:[%s1423_s1 + $0x78] sm:$0xff] (!%p140_p2)   ;;  %v1110_v28 = vld [vmem:[%s1423_s1 + $0xc0] sm:$0xff] (!%p140_p2)  }
   0xc   : > { %1007 = vmatpush3.bf16.msra.mxu0 (!%p140_p2), %v1088_v6  ;;  %729 = vmatprep.subr.bf16.mxu1 (!%p140_p2), %v1206_v1  ;;  %v1102_v20 = vld [vmem:[%s1423_s1 + $0xb0] sm:$0xff] (!%p140_p2)   ;;  %v1105_v24 = vld [vmem:[%s1423_s1 + $0xb8] sm:$0xff] (!%p140_p2)   ;;  %v1375_v0 = vld [vmem:[%s1424_s2] ss:$0 sm:$0xff] (!%p140_p2) }
   0xd   : > { %1008 = vmatprep.subr.bf16.mxu0 %v1089_v7  ;;  %s1427_s30 = smov (!%p165_p3, %s164_s30), 35  ;;  %v1103_v21 = vld [vmem:[%s1423_s1 + $0x30] sm:$0xff]   ;;  %v1106_v26 = vld [vmem:[%s1423_s1 + $0x38] sm:$0xff]  }
   0xe   : > { %s1003_s23 = sshll.u32 %s1427_s30, 4  ;;  %s929_s20 = sshll.u32 %s1427_s30, 3 }
   0xf   : > { %730 = vmatpush1.bf16.msra.mxu1 %v1090_v8  ;;  %s1307_s6 = scalar_lea.vmem %s1422_s0, %s1003_s23  ;;  %s1385_s23 = scalar_lea.vmem %s1425_s3, %s929_s20 }
  0x10   : > { %1009 = vmatpush3.bf16.msra.mxu0 %v1091_v9  ;;  %731 = vmatprep.subr.bf16.mxu1 %v1206_v1  ;;  %v1109_v23 = vld [vmem:[%s1307_s6 + $0x4] ss:$16 sps:$4 sm:$0xff]   ;;  %v1113_v25 = vld [vmem:[%s1307_s6 + $0xc] ss:$16 sps:$4 sm:$0xff]   ;;  %v1107_v27 = vld [vmem:[%s1307_s6] ss:$16 sps:$4 sm:$0xff]  }
  0x11   : > { %1010 = vmatprep.subr.bf16.mxu0 %v1092_v10  ;;  %652 = vmatprep.mubr.bf16.mxu0 %v1109_v23  ;;  %v1114_v29 = vld [vmem:[%s1307_s6 + $0x24] ss:$16 sps:$4 sm:$0xff]   ;;  %v1111_v30 = vld [vmem:[%s1307_s6 + $0x8] ss:$16 sps:$4 sm:$0xff]   ;;  %v1117_v31 = vld [vmem:[%s1307_s6 + $0x2c] ss:$16 sps:$4 sm:$0xff]  }
  0x12   : > { %992 = vmatprep.mubr.msk.bf16.mxu1 %vm592_vm0, %v1113_v25  ;;  %v1116_v32 = vld [vmem:[%s1307_s6 + $0x20] ss:$16 sps:$4 sm:$0xff]   ;;  %v1120_v33 = vld [vmem:[%s1307_s6 + $0x44] ss:$16 sps:$4 sm:$0xff]   ;;  %v1119_v34 = vld [vmem:[%s1307_s6 + $0x28] ss:$16 sps:$4 sm:$0xff]  }
  0x13   : > { %732 = vmatpush1.bf16.msra.mxu1 %v1093_v11  ;;  %v1123_v35 = vld [vmem:[%s1307_s6 + $0x4c] ss:$16 sps:$4 sm:$0xff]   ;;  %v1122_v36 = vld [vmem:[%s1307_s6 + $0x40] ss:$16 sps:$4 sm:$0xff]   ;;  %v1126_v37 = vld [vmem:[%s1307_s6 + $0x64] ss:$16 sps:$4 sm:$0xff]  }
  0x14   : > { %1011 = vmatpush3.bf16.msra.mxu0 %v1094_v12  ;;  %733 = vmatprep.subr.bf16.mxu1 %v1206_v1  ;;  %v1125_v38 = vld [vmem:[%s1307_s6 + $0x48] ss:$16 sps:$4 sm:$0xff]   ;;  %v1129_v39 = vld [vmem:[%s1307_s6 + $0x6c] ss:$16 sps:$4 sm:$0xff]   ;;  %v1128_v40 = vld [vmem:[%s1307_s6 + $0x60] ss:$16 sps:$4 sm:$0xff]  }
  0x15   : > { %1012 = vmatprep.subr.bf16.mxu0 %v1095_v13  ;;  %v1132_v41 = vld [vmem:[%s1307_s6 + $0x84] ss:$16 sps:$4 sm:$0xff]   ;;  %v1131_v42 = vld [vmem:[%s1307_s6 + $0x68] ss:$16 sps:$4 sm:$0xff]   ;;  %v1135_v43 = vld [vmem:[%s1307_s6 + $0x8c] ss:$16 sps:$4 sm:$0xff]  }
  0x16   : > { %v1134_v44 = vld [vmem:[%s1307_s6 + $0x80] ss:$16 sps:$4 sm:$0xff]   ;;  %v1138_v45 = vld [vmem:[%s1307_s6 + $0xa4] ss:$16 sps:$4 sm:$0xff]   ;;  %v1137_v46 = vld [vmem:[%s1307_s6 + $0x88] ss:$16 sps:$4 sm:$0xff]  }
  0x17   : > { %734 = vmatpush1.bf16.msra.mxu1 %v1096_v14  ;;  %v1141_v47 = vld [vmem:[%s1307_s6 + $0xac] ss:$16 sps:$4 sm:$0xff]   ;;  %v1140_v48 = vld [vmem:[%s1307_s6 + $0xa0] ss:$16 sps:$4 sm:$0xff]   ;;  %v1144_v49 = vld [vmem:[%s1307_s6 + $0xc4] ss:$16 sps:$4 sm:$0xff]  }
  0x18   : > { %1013 = vmatpush3.bf16.msra.mxu0 %v1097_v15  ;;  %735 = vmatprep.subr.bf16.mxu1 %v1206_v1  ;;  %v1143_v50 = vld [vmem:[%s1307_s6 + $0xa8] ss:$16 sps:$4 sm:$0xff]   ;;  %v1147_v51 = vld [vmem:[%s1307_s6 + $0xcc] ss:$16 sps:$4 sm:$0xff]   ;;  %v1146_v52 = vld [vmem:[%s1307_s6 + $0xc0] ss:$16 sps:$4 sm:$0xff]  }
  0x19   : > { %1014 = vmatprep.subr.bf16.mxu0 %v1098_v16  ;;  %v1150_v53 = vld [vmem:[%s1307_s6 + $0xe4] ss:$16 sps:$4 sm:$0xff]   ;;  %v1149_v54 = vld [vmem:[%s1307_s6 + $0xc8] ss:$16 sps:$4 sm:$0xff]   ;;  %v1153_v55 = vld [vmem:[%s1307_s6 + $0xec] ss:$16 sps:$4 sm:$0xff]  }
  0x1a   : > { %v1152_v56 = vld [vmem:[%s1307_s6 + $0xe0] ss:$16 sps:$4 sm:$0xff]   ;;  %v1156_v57 = vld [vmem:[%s1307_s6 + $0x104] ss:$16 sps:$4 sm:$0xff]   ;;  %v1155_v58 = vld [vmem:[%s1307_s6 + $0xe8] ss:$16 sps:$4 sm:$0xff]  }
  0x1b   : > { %736 = vmatpush1.bf16.msra.mxu1 %v1099_v17  ;;  %v1159_v59 = vld [vmem:[%s1307_s6 + $0x10c] ss:$16 sps:$4 sm:$0xff]   ;;  %v1158_v60 = vld [vmem:[%s1307_s6 + $0x100] ss:$16 sps:$4 sm:$0xff]   ;;  %v1161_v61 = vld [vmem:[%s1307_s6 + $0x108] ss:$16 sps:$4 sm:$0xff]  }
  0x1c   : > { %1015 = vmatpush3.bf16.msra.mxu0 %v1100_v18  ;;  %737 = vmatprep.subr.bf16.mxu1 %v1206_v1 }
  0x1d   : > { %1016 = vmatprep.subr.bf16.mxu0 %v1101_v19 }
  0x1f   : > { %738 = vmatpush1.bf16.msra.mxu1 %v1102_v20 }
  0x20   : > { %1017 = vmatpush3.bf16.msra.mxu0 %v1103_v21  ;;  %739 = vmatprep.subr.bf16.mxu1 %v1206_v1 }
  0x21   : > { %1018 = vmatprep.subr.bf16.mxu0 %v1104_v22 }
  0x23   : > { %740 = vmatpush1.bf16.msra.mxu1 %v1105_v24 }
  0x24   : > { %1019 = vmatpush3.bf16.msra.mxu0 %v1106_v26  ;;  %741 = vmatprep.subr.bf16.mxu1 %v1206_v1 }
  0x27   : > { %653 = vmatmul.mubr.bf16.vlgmr.msra.gmra.mrb[0].mxu0 %v1107_v27  ;;  %742 = vmatpush1.bf16.msra.mxu1 %v1110_v28 }
  0x28   : > { %660 = vmatprep.mubr.bf16.mxu0 %v1114_v29 }
  0x2a   : > { %758 = vmatmul.mubr.bf16.vlgmr.msra.gmra.mrb[0].mxu1 %v1111_v30 }
  0x2b   : > { %993 = vmatprep.mubr.msk.bf16.mxu1 %vm592_vm0, %v1117_v31 }
  0x2f   : > { %661 = vmatmul.mubr.bf16.gmra.mrb[4].mxu0 %v1116_v32 }
  0x30   : > { %668 = vmatprep.mubr.bf16.mxu0 %v1120_v33 }
  0x32   : > { %766 = vmatmul.mubr.bf16.gmra.mrb[4].mxu1 %v1119_v34 }
  0x33   : > { %994 = vmatprep.mubr.msk.bf16.mxu1 %vm592_vm0, %v1123_v35 }
  0x37   : > { %669 = vmatmul.mubr.bf16.gmra.mrb[8].mxu0 %v1122_v36 }
  0x38   : > { %676 = vmatprep.mubr.bf16.mxu0 %v1126_v37 }
  0x3a   : > { %774 = vmatmul.mubr.bf16.gmra.mrb[8].mxu1 %v1125_v38 }
  0x3b   : > { %995 = vmatprep.mubr.msk.bf16.mxu1 %vm592_vm0, %v1129_v39 }
  0x3f   : > { %677 = vmatmul.mubr.bf16.gmra.mrb[12].mxu0 %v1128_v40 }
  0x40   : > { %684 = vmatprep.mubr.bf16.mxu0 %v1132_v41 }
  0x42   : > { %782 = vmatmul.mubr.bf16.gmra.mrb[12].mxu1 %v1131_v42 }
  0x43   : > { %996 = vmatprep.mubr.msk.bf16.mxu1 %vm592_vm0, %v1135_v43 }
  0x47   : > { %685 = vmatmul.mubr.bf16.gmra.mrb[16].mxu0 %v1134_v44 }
  0x48   : > { %692 = vmatprep.mubr.bf16.mxu0 %v1138_v45 }
  0x4a   : > { %790 = vmatmul.mubr.bf16.gmra.mrb[16].mxu1 %v1137_v46 }
  0x4b   : > { %997 = vmatprep.mubr.msk.bf16.mxu1 %vm592_vm0, %v1141_v47 }
  0x4f   : > { %693 = vmatmul.mubr.bf16.gmra.mrb[20].mxu0 %v1140_v48 }
  0x50   : > { %700 = vmatprep.mubr.bf16.mxu0 %v1144_v49 }
  0x52   : > { %798 = vmatmul.mubr.bf16.gmra.mrb[20].mxu1 %v1143_v50 }
  0x53   : > { %998 = vmatprep.mubr.msk.bf16.mxu1 %vm592_vm0, %v1147_v51 }
  0x57   : > { %701 = vmatmul.mubr.bf16.gmra.mrb[24].mxu0 %v1146_v52 }
  0x58   : > { %708 = vmatprep.mubr.bf16.mxu0 %v1150_v53 }
  0x5a   : > { %806 = vmatmul.mubr.bf16.gmra.mrb[24].mxu1 %v1149_v54 }
  0x5b   : > { %999 = vmatprep.mubr.msk.bf16.mxu1 %vm592_vm0, %v1153_v55 }
  0x5f   : > { %709 = vmatmul.mubr.bf16.gmra.mrb[28].mxu0 %v1152_v56 }
  0x60   : > { %716 = vmatprep.mubr.bf16.mxu0 %v1156_v57 }
  0x62   : > { %814 = vmatmul.mubr.bf16.gmra.mrb[28].mxu1 %v1155_v58 }
  0x63   : > { %1000 = vmatprep.mubr.msk.bf16.mxu1 %vm592_vm0, %v1159_v59 }
  0x67   : > { %717 = vmatmul.mubr.bf16.gmra.mrb[32].mxu0 %v1158_v60 }
  0x6a   : > { %822 = vmatmul.mubr.bf16.gmra.mrb[32].mxu1 %v1161_v61 }
  0xfa   : > { %v1020_v62 = vpop.f32.mrb[0].mxu0 }
  0xfb   : > { %v1021_v63 = vpop.f32.mrb[1].mxu0 }
  0xfc   : > { %v1022_v1 = vadd.f32 %v1021_v63, %v1020_v62  ;;  %v1023_v2 = vpop.f32.mrb[2].mxu0 }
  0xfd   : > { %v1024_v3 = vpop.f32.mrb[3].mxu0  ;;  %v759_v4 = vpop.f32.mrb[0].mxu1 }
  0xfe   : > { %v1025_v5 = vadd.f32 %v1024_v3, %v1023_v2  ;;  %v655_v6 = vadd.f32 %v1022_v1, %v1375_v0  ;;  %v761_v7 = vpop.f32.mrb[1].mxu1 }
  0xff   : > { %v762_v8 = vpop.f32.mrb[2].mxu1 }
 0x100   : > { %v760_v9 = vadd.f32 %v759_v4, %v655_v6  ;;  %v658_v10 = vadd.f32 %v1025_v5, %v1375_v0  ;;  %v764_v11 = vpop.f32.mrb[3].mxu1 }
 0x102   : > { %1162 = vtanh.f32 %v760_v9  ;;  %v763_v12 = vadd.f32 %v762_v8, %v658_v10  ;;  %v1026_v13 = vpop.f32.mrb[4].mxu0 }
 0x103   : > { %v1027_v14 = vpop.f32.mrb[5].mxu0 }
 0x104   : > { %1164 = vtanh.f32 %v763_v12  ;;  %v1028_v15 = vadd.f32 %v1027_v14, %v1026_v13  ;;  %v1029_v16 = vpop.f32.mrb[6].mxu0 }
 0x105   : > { %v1030_v17 = vpop.f32.mrb[7].mxu0  ;;  %v767_v18 = vpop.f32.mrb[4].mxu1 }
 0x106   : > { %v1031_v19 = vadd.f32 %v1030_v17, %v1029_v16  ;;  %v663_v20 = vadd.f32 %v1028_v15, %v1375_v0  ;;  %v769_v21 = vpop.f32.mrb[5].mxu1 }
 0x107   : > { %v770_v22 = vpop.f32.mrb[6].mxu1 }
 0x108   : > { %v768_v23 = vadd.f32 %v767_v18, %v663_v20  ;;  %v666_v24 = vadd.f32 %v1031_v19, %v1375_v0  ;;  %v772_v25 = vpop.f32.mrb[7].mxu1 }
 0x10a   : > { %1166 = vtanh.f32 %v768_v23  ;;  %v771_v26 = vadd.f32 %v770_v22, %v666_v24  ;;  %v1032_v27 = vpop.f32.mrb[8].mxu0 }
 0x10b   : > { %v1033_v28 = vpop.f32.mrb[9].mxu0 }
 0x10c   : > { %v1163_v29 = vpop.eup %1162  ;;  %1168 = vtanh.f32 %v771_v26  ;;  %v1034_v30 = vadd.f32 %v1033_v28, %v1032_v27  ;;  %v1035_v31 = vpop.f32.mrb[10].mxu0 }
 0x10d   : > { %848 = vst [vmem:[%s1385_s23] sm:$0xff] %v1163_v29  ;;  %v1036_v32 = vpop.f32.mrb[11].mxu0  ;;  %v775_v33 = vpop.f32.mrb[8].mxu1 }
 0x10e   : > { %v1165_v34 = vpop.eup %1164  ;;  %v1037_v35 = vadd.f32 %v1036_v32, %v1035_v31  ;;  %v671_v36 = vadd.f32 %v1034_v30, %v1375_v0  ;;  %v777_v37 = vpop.f32.mrb[9].mxu1 }
 0x10f   : > { %849 = vst [vmem:[%s1385_s23 + $0x8] sm:$0xff] %v1165_v34  ;;  %v778_v38 = vpop.f32.mrb[10].mxu1 }
 0x110   : > { %v776_v39 = vadd.f32 %v775_v33, %v671_v36  ;;  %v674_v40 = vadd.f32 %v1037_v35, %v1375_v0  ;;  %v780_v41 = vpop.f32.mrb[11].mxu1 }
 0x112   : > { %1170 = vtanh.f32 %v776_v39  ;;  %v779_v42 = vadd.f32 %v778_v38, %v674_v40  ;;  %v1038_v43 = vpop.f32.mrb[12].mxu0 }
 0x113   : > { %v1039_v44 = vpop.f32.mrb[13].mxu0 }
 0x114   : > { %v1167_v45 = vpop.eup %1166  ;;  %1172 = vtanh.f32 %v779_v42  ;;  %v1040_v46 = vadd.f32 %v1039_v44, %v1038_v43  ;;  %v1041_v47 = vpop.f32.mrb[14].mxu0 }
 0x115   : > { %850 = vst [vmem:[%s1385_s23 + $0x10] sm:$0xff] %v1167_v45  ;;  %v1042_v48 = vpop.f32.mrb[15].mxu0  ;;  %v783_v49 = vpop.f32.mrb[12].mxu1 }
 0x116   : > { %v1169_v50 = vpop.eup %1168  ;;  %v1043_v51 = vadd.f32 %v1042_v48, %v1041_v47  ;;  %v679_v52 = vadd.f32 %v1040_v46, %v1375_v0  ;;  %v785_v53 = vpop.f32.mrb[13].mxu1 }
 0x117   : > { %851 = vst [vmem:[%s1385_s23 + $0x18] sm:$0xff] %v1169_v50  ;;  %v786_v54 = vpop.f32.mrb[14].mxu1 }
 0x118   : > { %v784_v55 = vadd.f32 %v783_v49, %v679_v52  ;;  %v682_v56 = vadd.f32 %v1043_v51, %v1375_v0  ;;  %v788_v57 = vpop.f32.mrb[15].mxu1 }
 0x11a   : > { %1174 = vtanh.f32 %v784_v55  ;;  %v787_v58 = vadd.f32 %v786_v54, %v682_v56  ;;  %v1044_v59 = vpop.f32.mrb[16].mxu0 }
 0x11b   : > { %v1045_v60 = vpop.f32.mrb[17].mxu0 }
 0x11c   : > { %v1171_v61 = vpop.eup %1170  ;;  %1176 = vtanh.f32 %v787_v58  ;;  %v1046_v62 = vadd.f32 %v1045_v60, %v1044_v59  ;;  %v1047_v63 = vpop.f32.mrb[18].mxu0 }
 0x11d   : > { %852 = vst [vmem:[%s1385_s23 + $0x20] sm:$0xff] %v1171_v61  ;;  %v1048_v1 = vpop.f32.mrb[19].mxu0  ;;  %v791_v2 = vpop.f32.mrb[16].mxu1 }
 0x11e   : > { %v1173_v3 = vpop.eup %1172  ;;  %v1049_v4 = vadd.f32 %v1048_v1, %v1047_v63  ;;  %v687_v5 = vadd.f32 %v1046_v62, %v1375_v0  ;;  %v793_v6 = vpop.f32.mrb[17].mxu1 }
 0x11f   : > { %853 = vst [vmem:[%s1385_s23 + $0x28] sm:$0xff] %v1173_v3  ;;  %v794_v7 = vpop.f32.mrb[18].mxu1 }
 0x120   : > { %v792_v8 = vadd.f32 %v791_v2, %v687_v5  ;;  %v690_v9 = vadd.f32 %v1049_v4, %v1375_v0  ;;  %v796_v10 = vpop.f32.mrb[19].mxu1 }
 0x122   : > { %1178 = vtanh.f32 %v792_v8  ;;  %v795_v11 = vadd.f32 %v794_v7, %v690_v9  ;;  %v1050_v12 = vpop.f32.mrb[20].mxu0 }
 0x123   : > { %v1051_v13 = vpop.f32.mrb[21].mxu0 }
 0x124   : > { %v1175_v14 = vpop.eup %1174  ;;  %1180 = vtanh.f32 %v795_v11  ;;  %v1052_v15 = vadd.f32 %v1051_v13, %v1050_v12  ;;  %v1053_v16 = vpop.f32.mrb[22].mxu0 }
 0x125   : > { %854 = vst [vmem:[%s1385_s23 + $0x30] sm:$0xff] %v1175_v14  ;;  %v1054_v17 = vpop.f32.mrb[23].mxu0  ;;  %v799_v18 = vpop.f32.mrb[20].mxu1 }
 0x126   : > { %v1177_v19 = vpop.eup %1176  ;;  %v1055_v20 = vadd.f32 %v1054_v17, %v1053_v16  ;;  %v695_v21 = vadd.f32 %v1052_v15, %v1375_v0  ;;  %v801_v22 = vpop.f32.mrb[21].mxu1 }
 0x127   : > { %855 = vst [vmem:[%s1385_s23 + $0x38] sm:$0xff] %v1177_v19  ;;  %v802_v23 = vpop.f32.mrb[22].mxu1 }
 0x128   : > { %v800_v24 = vadd.f32 %v799_v18, %v695_v21  ;;  %v698_v25 = vadd.f32 %v1055_v20, %v1375_v0  ;;  %v804_v26 = vpop.f32.mrb[23].mxu1 }
 0x12a   : > { %1182 = vtanh.f32 %v800_v24  ;;  %v803_v27 = vadd.f32 %v802_v23, %v698_v25  ;;  %v1056_v28 = vpop.f32.mrb[24].mxu0 }
 0x12b   : > { %v1057_v29 = vpop.f32.mrb[25].mxu0 }
 0x12c   : > { %v1179_v30 = vpop.eup %1178  ;;  %1184 = vtanh.f32 %v803_v27  ;;  %v1058_v31 = vadd.f32 %v1057_v29, %v1056_v28  ;;  %v1059_v32 = vpop.f32.mrb[26].mxu0 }
 0x12d   : > { %856 = vst [vmem:[%s1385_s23 + $0x40] sm:$0xff] %v1179_v30  ;;  %v1060_v33 = vpop.f32.mrb[27].mxu0  ;;  %v807_v34 = vpop.f32.mrb[24].mxu1 }
 0x12e   : > { %v1181_v35 = vpop.eup %1180  ;;  %v1061_v36 = vadd.f32 %v1060_v33, %v1059_v32  ;;  %v703_v37 = vadd.f32 %v1058_v31, %v1375_v0  ;;  %v809_v38 = vpop.f32.mrb[25].mxu1 }
 0x12f   : > { %857 = vst [vmem:[%s1385_s23 + $0x48] sm:$0xff] %v1181_v35  ;;  %v810_v39 = vpop.f32.mrb[26].mxu1 }
 0x130   : > { %v808_v40 = vadd.f32 %v807_v34, %v703_v37  ;;  %v706_v41 = vadd.f32 %v1061_v36, %v1375_v0  ;;  %v812_v42 = vpop.f32.mrb[27].mxu1 }
 0x132   : > { %1186 = vtanh.f32 %v808_v40  ;;  %v811_v43 = vadd.f32 %v810_v39, %v706_v41  ;;  %v1062_v44 = vpop.f32.mrb[28].mxu0 }
 0x133   : > { %v1063_v45 = vpop.f32.mrb[29].mxu0 }
 0x134   : > { %v1183_v46 = vpop.eup %1182  ;;  %1188 = vtanh.f32 %v811_v43  ;;  %v1064_v47 = vadd.f32 %v1063_v45, %v1062_v44  ;;  %v1065_v48 = vpop.f32.mrb[30].mxu0 }
 0x135   : > { %858 = vst [vmem:[%s1385_s23 + $0x50] sm:$0xff] %v1183_v46  ;;  %v1066_v49 = vpop.f32.mrb[31].mxu0  ;;  %v815_v50 = vpop.f32.mrb[28].mxu1 }
 0x136   : > { %v1185_v51 = vpop.eup %1184  ;;  %v1067_v52 = vadd.f32 %v1066_v49, %v1065_v48  ;;  %v711_v53 = vadd.f32 %v1064_v47, %v1375_v0  ;;  %v817_v54 = vpop.f32.mrb[29].mxu1 }
 0x137   : > { %859 = vst [vmem:[%s1385_s23 + $0x58] sm:$0xff] %v1185_v51  ;;  %v818_v55 = vpop.f32.mrb[30].mxu1 }
 0x138   : > { %v816_v56 = vadd.f32 %v815_v50, %v711_v53  ;;  %v714_v57 = vadd.f32 %v1067_v52, %v1375_v0  ;;  %v820_v58 = vpop.f32.mrb[31].mxu1 }
 0x13a   : > { %1190 = vtanh.f32 %v816_v56  ;;  %v819_v59 = vadd.f32 %v818_v55, %v714_v57  ;;  %v1068_v60 = vpop.f32.mrb[32].mxu0 }
 0x13b   : > { %v1069_v61 = vpop.f32.mrb[33].mxu0 }
 0x13c   : > { %v1187_v62 = vpop.eup %1186  ;;  %1192 = vtanh.f32 %v819_v59  ;;  %v1070_v63 = vadd.f32 %v1069_v61, %v1068_v60  ;;  %v1071_v1 = vpop.f32.mrb[34].mxu0 }
 0x13d   : > { %860 = vst [vmem:[%s1385_s23 + $0x60] sm:$0xff] %v1187_v62  ;;  %v1072_v2 = vpop.f32.mrb[35].mxu0  ;;  %v823_v3 = vpop.f32.mrb[32].mxu1 }
 0x13e   : > { %v1189_v4 = vpop.eup %1188  ;;  %v1073_v5 = vadd.f32 %v1072_v2, %v1071_v1  ;;  %v719_v6 = vadd.f32 %v1070_v63, %v1375_v0  ;;  %v825_v7 = vpop.f32.mrb[33].mxu1 }
 0x13f   : > { %861 = vst [vmem:[%s1385_s23 + $0x68] sm:$0xff] %v1189_v4  ;;  %v826_v8 = vpop.f32.mrb[34].mxu1 }
 0x140   : > { %v824_v9 = vadd.f32 %v823_v3, %v719_v6  ;;  %v722_v10 = vadd.f32 %v1073_v5, %v1375_v0  ;;  %v828_v11 = vpop.f32.mrb[35].mxu1 }
 0x142   : > { %1194 = vtanh.f32 %v824_v9  ;;  %v827_v12 = vadd.f32 %v826_v8, %v722_v10 }
 0x144   : > { %v1191_v13 = vpop.eup %1190  ;;  %1196 = vtanh.f32 %v827_v12 }
 0x145   : > { %862 = vst [vmem:[%s1385_s23 + $0x70] sm:$0xff] %v1191_v13 }
 0x146   : > { %v1193_v14 = vpop.eup %1192 }
 0x147   : > { %863 = vst [vmem:[%s1385_s23 + $0x78] sm:$0xff] %v1193_v14 }
 0x14c   : > { %v1195_v15 = vpop.eup %1194 }
 0x14d   : > { %864 = vst [vmem:[%s1385_s23 + $0x80] sm:$0xff] %v1195_v15 }
 0x14e   : > { %v1197_v16 = vpop.eup %1196 }
 0x14f   : > { %865 = vst [vmem:[%s1385_s23 + $0x88] sm:$0xff] %v1197_v16 }
 0x150 PF: > { %s13_s12 = sadd.s32 1, %s1204_s12  }
 0x151   : > { %p10_p4 = scmp.ge.s32.totalorder %s13_s12, 4  }
 0x153   :  { %12 = sbr.rel (!%p10_p4) target bundleno = 1 (0x1), region = 62 }

</bundles_post_ra>
